<compile_context>
chip_gen: v7x
topology: tpu7x:2x2x1
jax: 0.10.0
libtpu: 0.0.40
codegen_flags: <defaults>
</compile_context>

<pallas_src>
import functools

import jax
import jax.numpy as jnp
from jax.experimental import pallas as pl
from jax.experimental.pallas import tpu as pltpu


_LANE = 128
_MAX_TILE_ROWS = 512  # ~85% of HBM roofline plateau; larger only adds VMEM pressure


def _sublane_multiple(dtype) -> int:
    """Minimum row (sublane) multiple for the packed dtype layout."""
    itemsize = jnp.dtype(dtype).itemsize
    if itemsize >= 4:
        return 8
    if itemsize == 2:
        return 16
    return 32


def _vmem_budgets():
    """(pipelined-buffer budget, scoped vmem limit) tuned per generation."""
    try:
        cap = pltpu.get_tpu_info().vmem_capacity_bytes
    except Exception:  # not on TPU / info unavailable -> conservative default
        cap = 128 * 1024 * 1024
    if cap <= 64 * 1024 * 1024:           # v7x: 64 MiB per TensorCore
        return 20 * 1024 * 1024, 40 * 1024 * 1024
    return 32 * 1024 * 1024, 48 * 1024 * 1024   # v5e / v6e: 128 MiB


def _choose_row_tile(rows: int, features: int, dtype, buffer_budget: int) -> int:
    """Row tile: dtype-aligned, fits VMEM (incl. f32 intermediates), <=512 rows,
    and small enough that the grid has >=2 steps when rows permit (v7x megacore)."""
    sub = _sublane_multiple(dtype)
    itemsize = jnp.dtype(dtype).itemsize
    f_lane = ((features + _LANE - 1) // _LANE) * _LANE  # lane-padded width in VMEM
    # 2 arrays (x in + out) x 2 pipeline buffers, plus ~2 f32 tiles of in-kernel
    # intermediates (upcast x, pre-cast out).
    per_row = 4 * f_lane * itemsize + 2 * f_lane * 4
    tile = max(buffer_budget // per_row, sub)
    tile = min(tile, _MAX_TILE_ROWS, max(rows, sub))
    if rows > sub:
        # Cap at ceil(rows/2) rounded up to the sublane multiple so the row grid
        # has at least 2 (balanced) steps -> both v7x TensorCores get work.
        half = (((rows + 1) // 2) + sub - 1) // sub * sub
        tile = min(tile, half)
    tile = max((tile // sub) * sub, sub)
    return tile


def _layernorm_kernel(x_ref, a_ref, b_ref, o_ref, *, eps):
    # x_ref: (tile_rows, F)   a_ref / b_ref: (1, F) float32
    x = x_ref[...].astype(jnp.float32)
    a = a_ref[...]   # scale (a_2), already f32
    b = b_ref[...]   # bias  (b_2), already f32

    inv_n = 1.0 / float(x.shape[-1])
    mean = jnp.sum(x, axis=-1, keepdims=True) * inv_n
    diff = x - mean                                   # two-pass: numerically safe
    var = jnp.sum(diff * diff, axis=-1, keepdims=True) * inv_n

    inv = jax.lax.rsqrt(var + eps) * a                # (rows,1)*(1,F) -> (rows,F)
    out = x * inv + (b - mean * inv)
    o_ref[...] = out.astype(o_ref.dtype)


def layer_norm(x, a_2, b_2, *, eps=1e-12):
    """Pallas LayerNorm matching the PyTorch module's forward (last-axis norm)."""
    orig_shape = x.shape
    features = int(orig_shape[-1])
    rows = 1
    for d in orig_shape[:-1]:
        rows *= int(d)

    x2 = x.reshape(rows, features)
    a2 = a_2.reshape(1, features).astype(jnp.float32)
    b2 = b_2.reshape(1, features).astype(jnp.float32)

    buffer_budget, vmem_limit = _vmem_budgets()
    tile = _choose_row_tile(rows, features, x.dtype, buffer_budget)
    grid = (pl.cdiv(rows, tile),)   # ragged last block handled by Pallas

    itemsize = jnp.dtype(x.dtype).itemsize
    cost = pl.CostEstimate(
        flops=8 * rows * features,
        transcendentals=rows,
        bytes_accessed=2 * rows * features * itemsize + 2 * features * 4,
    )

    out = pl.pallas_call(
        functools.partial(_layernorm_kernel, eps=eps),
        out_shape=jax.ShapeDtypeStruct((rows, features), x.dtype),
        grid_spec=pltpu.PrefetchScalarGridSpec(
            num_scalar_prefetch=0,
            grid=grid,
            in_specs=[
                pl.BlockSpec((tile, features), lambda i: (i, 0)),
                pl.BlockSpec((1, features), lambda i: (0, 0)),
                pl.BlockSpec((1, features), lambda i: (0, 0)),
            ],
            out_specs=pl.BlockSpec((tile, features), lambda i: (i, 0)),
        ),
        compiler_params=pltpu.CompilerParams(
            dimension_semantics=("parallel",),
            vmem_limit_bytes=vmem_limit,
        ),
        cost_estimate=cost,
    )(x2, a2, b2)

    return out.reshape(orig_shape)


def _reference_layernorm(x, a_2, b_2, eps=1e-12):
    x = x.astype(jnp.float32)
    mean = jnp.mean(x, axis=-1, keepdims=True)
    var = jnp.mean((x - mean) ** 2, axis=-1, keepdims=True)
    inv = jax.lax.rsqrt(var + eps) * a_2
    return x * inv + (b_2 - mean * inv)


if __name__ == "__main__":
    key = jax.random.PRNGKey(0)
    batch, seq, hidden = 2, 8, 32

    x = jax.random.normal(key, (batch, seq, hidden), dtype=jnp.float32)
    # Deterministic parameter init matching nn.Parameter(torch.ones/zeros(features))
    a_2 = jnp.ones((hidden,), dtype=jnp.float32)
    b_2 = jnp.zeros((hidden,), dtype=jnp.float32)

    out = layer_norm(x, a_2, b_2, eps=1e-12)
    out = jax.block_until_ready(out)

    ref = _reference_layernorm(x, a_2, b_2, eps=1e-12)
    assert out.shape == x.shape
    assert jnp.allclose(out, ref, atol=1e-5, rtol=1e-5), "mismatch vs reference"

    print("KERNEL_OK")
</pallas_src>

<mosaic_0001>
module attributes {stable_mosaic.version = 11 : i64} {
  func.func @_layernorm_kernel(%arg0: i32, %arg1: memref<8x32xf32, #tpu.memory_space<vmem>>, %arg2: memref<1x32xf32, #tpu.memory_space<vmem>>, %arg3: memref<1x32xf32, #tpu.memory_space<vmem>>, %arg4: memref<8x32xf32, #tpu.memory_space<vmem>>) attributes {dimension_semantics = [#tpu.dimension_semantics<parallel>], iteration_bounds = array<i64: 2>, scalar_prefetch = 0 : i64, scratch_operands = 0 : i64, tpu.core_type = #tpu.core_type<tc>, window_params = [{transform_indices = @transform_0, window_bounds = array<i64: 8, 32>}, {pipeline_mode = #tpu.pipeline_mode<synchronous>, transform_indices = @transform_1, window_bounds = array<i64: 1, 32>}, {pipeline_mode = #tpu.pipeline_mode<synchronous>, transform_indices = @transform_2, window_bounds = array<i64: 1, 32>}, {transform_indices = @transform_3, window_bounds = array<i64: 8, 32>}]} {
    %c0 = arith.constant 0 : index
    %c0_0 = arith.constant 0 : index
    %0 = vector.load %arg1[%c0, %c0_0] : memref<8x32xf32, #tpu.memory_space<vmem>>, vector<8x32xf32>
    %c0_1 = arith.constant 0 : index
    %c0_2 = arith.constant 0 : index
    %1 = vector.load %arg2[%c0_1, %c0_2] : memref<1x32xf32, #tpu.memory_space<vmem>>, vector<1x32xf32>
    %c0_3 = arith.constant 0 : index
    %c0_4 = arith.constant 0 : index
    %2 = vector.load %arg3[%c0_3, %c0_4] : memref<1x32xf32, #tpu.memory_space<vmem>>, vector<1x32xf32>
    %cst = arith.constant dense<0.000000e+00> : vector<8xf32>
    %3 = vector.multi_reduction <add>, %0, %cst [1] : vector<8x32xf32> to vector<8xf32>
    %4 = vector.shape_cast %3 : vector<8xf32> to vector<8x1xf32>
    %cst_5 = arith.constant 3.125000e-02 : f32
    %5 = vector.broadcast %cst_5 : f32 to vector<8x1xf32>
    %6 = arith.mulf %4, %5 : vector<8x1xf32>
    %7 = vector.broadcast %6 : vector<8x1xf32> to vector<8x32xf32>
    %8 = arith.subf %0, %7 : vector<8x32xf32>
    %9 = arith.mulf %8, %8 : vector<8x32xf32>
    %cst_6 = arith.constant dense<0.000000e+00> : vector<8xf32>
    %10 = vector.multi_reduction <add>, %9, %cst_6 [1] : vector<8x32xf32> to vector<8xf32>
    %11 = vector.shape_cast %10 : vector<8xf32> to vector<8x1xf32>
    %cst_7 = arith.constant 3.125000e-02 : f32
    %12 = vector.broadcast %cst_7 : f32 to vector<8x1xf32>
    %13 = arith.mulf %11, %12 : vector<8x1xf32>
    %cst_8 = arith.constant 9.99999996E-13 : f32
    %14 = vector.broadcast %cst_8 : f32 to vector<8x1xf32>
    %15 = arith.addf %13, %14 : vector<8x1xf32>
    %16 = math.rsqrt %15 : vector<8x1xf32>
    %17 = vector.broadcast %16 : vector<8x1xf32> to vector<8x32xf32>
    %18 = vector.broadcast %1 : vector<1x32xf32> to vector<8x32xf32>
    %19 = arith.mulf %17, %18 : vector<8x32xf32>
    %20 = arith.mulf %0, %19 : vector<8x32xf32>
    %21 = vector.broadcast %6 : vector<8x1xf32> to vector<8x32xf32>
    %22 = arith.mulf %21, %19 : vector<8x32xf32>
    %23 = vector.broadcast %2 : vector<1x32xf32> to vector<8x32xf32>
    %24 = arith.subf %23, %22 : vector<8x32xf32>
    %25 = arith.addf %20, %24 : vector<8x32xf32>
    %c0_9 = arith.constant 0 : index
    %c0_10 = arith.constant 0 : index
    %26 = vector.load %arg4[%c0_9, %c0_10] : memref<8x32xf32, #tpu.memory_space<vmem>>, vector<8x32xf32>
    tpu.vector_store %arg4[%c0_9, %c0_10], %25 {strides = array<i32>} : memref<8x32xf32, #tpu.memory_space<vmem>>, vector<8x32xf32>,
    return
  }
  func.func @transform_0(%arg0: i32) -> (i32, i32) {
    %c0_i32 = arith.constant 0 : i32
    %c0_i32_0 = arith.constant 0 : i32
    return %arg0, %c0_i32 : i32, i32
  }
  func.func @transform_1(%arg0: i32) -> (i32, i32) {
    %c0_i32 = arith.constant 0 : i32
    %c0_i32_0 = arith.constant 0 : i32
    %c0_i32_1 = arith.constant 0 : i32
    return %c0_i32, %c0_i32_0 : i32, i32
  }
  func.func @transform_2(%arg0: i32) -> (i32, i32) {
    %c0_i32 = arith.constant 0 : i32
    %c0_i32_0 = arith.constant 0 : i32
    %c0_i32_1 = arith.constant 0 : i32
    return %c0_i32, %c0_i32_0 : i32, i32
  }
  func.func @transform_3(%arg0: i32) -> (i32, i32) {
    %c0_i32 = arith.constant 0 : i32
    %c0_i32_0 = arith.constant 0 : i32
    return %arg0, %c0_i32 : i32, i32
  }
}

</mosaic_0001>

<bundles_post_ra>
// kernel: tpu_custom_call.1
= control target key start
LH: loop header
LB: loop body
LE: loop exit
PB: predicated region body
PF: predicated region fallthrough
CT: control target
= control target key end

     0   :  { %8 = vsyncpa [#allocation3], 0  ;;  %s656_s0 = inlined_call_operand.hbm [shape: f32[16,32], index: 0, kind: input, shape index: {}]   ;;  %s657_s1 = inlined_call_operand.vmem [shape: f32[1,32], index: 1, kind: input, shape index: {}]   ;;  %s658_s2 = inlined_call_operand.vmem [shape: f32[1,32], index: 2, kind: input, shape index: {}]   ;;  %s659_s3 = inlined_call_operand.hbm [shape: f32[16,32], index: 3, kind: output, shape index: {}]  }
   0x1   :  { %10 = vsyncpa [#allocation3 + $0x1], 0 }
   0x2   :  { %11 = vsyncpa [#allocation4], 0 }
   0x3   :  { %13 = vsyncpa [#allocation4 + $0x1], 0  ;;  %s486_s12 = smov 0   ;;  %s488_s13 = smov 0  }
   0x4   :  { %s490_s14 = smov 0   ;;  %s492_s15 = smov 0  }
   0x5 LB: > { %s507_s16 = sadd.s32 4294967295, %s462_s15   ;;  %s304_s17 = sadd.s32 4294967294, %s462_s15   ;;  %s462_s15 = sphi %s492_s15, %s674_s15   ;;  %s458_s14 = sphi %s490_s14, %s673_s14   ;;  %s454_s13 = sphi %s488_s13, %s672_s13   ;;  %s450_s12 = sphi %s486_s12, %s671_s12  }
   0x6   : > { %s511_s18 = sadd.s32 1, %s462_s15   ;;  %s26_s19 = sadd.s32 1, %s458_s14 }
   0x7   : > { %s23_s20 = ssub.s32 %s462_s15, %s511_s18  ;;  %p33_p0 = scmp.ne.s32.totalorder %s458_s14, %s454_s13 }
   0x8   : > { %p24_p1 = scmp.eq.s32.totalorder %s23_s20, 0  ;;  %p34_p2 = scmp.eq.s32.totalorder %s462_s15, 0 }
   0x9   : > { %p39_p3 = scmp.ne.s32.totalorder %s454_s13, %s450_s12  ;;  %p40_p4 = scmp.eq.s32.totalorder %s507_s16, 0 }
   0xa   : > { %s523_s21 = scalar_select %p24_p1, %s458_s14, %s26_s19  }
   0xb   : > { %p525_p5 = por %p34_p2, %p33_p0  ;;  %p529_p6 = por %p40_p4, %p39_p3 }
   0xc   : > { %p105_p7 = scmp.eq.s32.totalorder %s507_s16, 1  ;;  %p111_p8 = scmp.eq.s32.totalorder %s304_s17, 1 }
   0xd   : > { %p330_p10 = scmp.lt.s32.totalorder %s462_s15, 2  ;;  %s137_s26 = sand.u32 1, %s458_s14  }
   0xe   : > { %p536_p11 = por %p105_p7, %p33_p0  ;;  %p540_p12 = por %p111_p8, %p39_p3 }
   0xf   : > { %s308_s27 = sshll.u32 %s462_s15, 7  ;;  %s307_s28 = sshll.u32 %s137_s26, 3 }
  0x10   : > { %s663_s24 = scalar_select %p536_p11, 1, 0 }
  0x11   : > { %s664_s25 = scalar_select %p540_p12, 1, 0 }
  0x12   : > { %s549_s4 = scalar_lea.hbm %s656_s0, %s308_s27  ;;  %s141_s5 = scalar_lea.vmem [#allocation2], %s307_s28 }
  0x13   : > { %s148_s6 = sshll.u32 %s141_s5, 4  ;;  %p553_p13 = pnand %p330_p10, %p525_p5  ;;  %s557_s6 = int_to_ptr.vmem [resolvable:$true] %s148_s6 }
  0x14   : > { %s138_s8 = scalar_lea.sflag [#allocation3], %s137_s26  ;;  %s366_s9 = scalar_lea.hbm %s549_s4, 128 }
  0x15   : > { %p367_p2 = scmp.ne.s32.totalorder %s549_s4, %s366_s9  ;;  %p368_p3 = pneg %p553_p13 }
  0x16   : > { %s371_s17 = scalar_lea.hbm %s656_s0, 256  ;;  %p372_p5 = scmp.lt.u32.totalorder %s549_s4, %s656_s0 }
  0x17   : > { %p369_p4 = pnand %p368_p3, %p367_p2  ;;  %p373_p8 = scmp.lt.u32.totalorder %s371_s17, %s366_s9 }
  0x18   : > { %p375_p9 = scmp.lt.u32.totalorder %s366_s9, %s549_s4 }
  0x19   : > { %p370_p7 = pneg %p369_p4  ;;  %p374_p10 = por %p373_p8, %p372_p5 }
  0x1b   : > { %p376_p0 = por %p375_p9, %p374_p10 }
  0x1d   : > { %p377_p1 = pnand %p376_p0, %p370_p7 }
  0x1f   : > { %380 = shalt.err (!%p377_p1)
}
  0x20   : > { %s381_s22 = scalar_lea.vmem %s557_s6, 128  ;;  %s464_s26 = smov [#allocation2]  }
  0x21   : > { %p382_p2 = scmp.ne.s32.totalorder %s557_s6, %s381_s22  ;;  %s386_s27 = sshll.u32 %s464_s26, 4  ;;  %s387_s27 = int_to_ptr.vmem [resolvable:$false] %s386_s27 }
  0x22   : > { %s388_s28 = scalar_lea.vmem %s387_s27, 256  ;;  %p389_p11 = scmp.lt.s32.totalorder %s557_s6, %s387_s27 }
  0x23   : > { %p384_p4 = pnand %p382_p2, %p368_p3  ;;  %p390_p5 = scmp.lt.s32.totalorder %s388_s28, %s381_s22 }
  0x25   : > { %p385_p12 = pneg %p384_p4  ;;  %p391_p8 = por %p390_p5, %p389_p11 }
  0x27   : > { %p392_p9 = pnand %p391_p8, %p385_p12 }
  0x29   : > { %395 = shalt.err (!%p392_p9)
}
  0x2a   : > { %325 = dma.hbm_to_vmem [thread:$0]  (!%p553_p13), %s549_s4, 128, %s557_s6, %s138_s8  }
  0x2b   : > { %p666_p0 = scmp.lt.s32.totalorder %s462_s15, 3  ;;  %p667_p1 = scmp.ge.s32.totalorder %s462_s15, 1 }
  0x2d   : > { %p154_p3 = pnand %p667_p1, %p666_p0 }
  0x2e   : > { %s591_s29 = sand.u32 (!%p154_p3), 1, %s454_s13  }
  0x2f   : > { %157 = sbr.rel (%p154_p3) target bundleno = 385 (0x181), region = 32  ;;  %s310_s30 = sshll.u32 (!%p154_p3), %s591_s29, 3 }
  0x30   : > { %s160_s5 = scalar_lea.sflag (!%p154_p3), [#allocation3], %s591_s29  ;;  %s163_s9 = scalar_lea.vmem (!%p154_p3), [#allocation2], %s310_s30 }
  0x36   : > { %441 = dma.done.wait (%p529_p6), %s160_s5, 128  }
  0x37   : > { %443 = vsyncadd (%p529_p6), %s160_s5, 4294967168  ;;  %vm189_vm0 = vcmask 261120   ;;  %v186_v0 = vld [vmem:[%s163_s9] sm:$0xff]  ;;  %s315_s8 = sshll.u32 %s507_s16, 7  ;;  %s185_s10 = scalar_lea.vmem [#allocation5], %s310_s30 }
  0x38   : > { %v190_v1 = vsel %vm189_vm0, %v186_v0, 0.0  ;;  %v312_v10 = vld [vmem:[%s657_s1] ss:$0 sm:$0xff]  ;;  %s234_s11 = sshll.u32 %s185_s10, 4  ;;  %s611_s20 = scalar_lea.hbm %s659_s3, %s315_s8  ;;  %s613_s11 = int_to_ptr.vmem [resolvable:$true] %s234_s11 }
  0x39   : > { %191 = vadd.xlane.f32.xlu0 %v190_v1  ;;  %v313_v13 = vld [vmem:[%s658_s2] ss:$0 sm:$0xff]  ;;  %s221_s22 = scalar_lea.sflag [#allocation4], %s591_s29  ;;  %s396_s26 = scalar_lea.vmem %s613_s11, 128 }
  0x3a   : > { %p397_p6 = scmp.ne.s32.totalorder %s613_s11, %s396_s26  ;;  %p668_p11 = scmp.ne.s32.totalorder %s663_s24, 0 }
  0x3b   : > { %s465_s16 = smov [#allocation5]  }
  0x3c   : > { %p398_p12 = pnand %p397_p6, %p668_p11  ;;  %s400_s27 = sshll.u32 %s465_s16, 4  ;;  %s401_s27 = int_to_ptr.vmem [resolvable:$false] %s400_s27 }
  0x3d   : > { %s402_s28 = scalar_lea.vmem %s401_s27, 256  ;;  %p403_p7 = scmp.lt.s32.totalorder %s613_s11, %s401_s27 }
  0x3e   : > { %p399_p13 = pneg %p398_p12  ;;  %p404_p10 = scmp.lt.s32.totalorder %s402_s28, %s396_s26 }
  0x40   : > { %p405_p2 = por %p404_p10, %p403_p7 }
  0x42   : > { %p406_p4 = pnand %p405_p2, %p399_p13 }
  0xc6   : > { %v192_v2 = vpop.xlane.xlu0 %191 }
  0xc7   : > { %v193_v3 = vmul.f32 0.03125, %v192_v2 }
  0xc9   : > { %v194_v4 = vsub.f32 %v186_v0, %v193_v3 }
  0xcb   : > { %v195_v5 = vmul.f32 %v194_v4, %v194_v4 }
  0xcd   : > { %v196_v6 = vsel %vm189_vm0, %v195_v5, 0.0 }
  0xce   : > { %197 = vadd.xlane.f32.xlu0 %v196_v6 }
 0x15b   : > { %v198_v7 = vpop.xlane.xlu0 %197 }
 0x15c   : > { %v199_v8 = vmul.f32 0.03125, %v198_v7 }
 0x15e   : > { %v200_v9 = vadd.f32 1e-12, %v199_v8 }
 0x160   : > { %364 = vrsqrt.f32 %v200_v9 }
 0x16a   : > { %v365_v11 = vpop.eup %364 }
 0x16b   : > { %v208_v12 = vmul.f32 %v365_v11, %v312_v10 }
 0x16d   : > { %v210_v14 = vmul.f32 %v208_v12, %v193_v3  ;;  %v209_v15 = vmul.f32 %v208_v12, %v186_v0 }
 0x16f   : > { %v217_v16 = vsub.f32 %v313_v13, %v210_v14 }
 0x171   : > { %v218_v17 = vadd.f32 %v217_v16, %v209_v15 }
 0x173   : > { %219 = vst.msk [vmem:[%s185_s10] sm:$0xff] %vm189_vm0, %v218_v17 }
 0x174   : > { %409 = shalt.err (!%p406_p4)
}
 0x175   : > { %s410_s29 = scalar_lea.hbm %s611_s20, 128  ;;  %s414_s9 = scalar_lea.hbm %s659_s3, 256 }
 0x176   : > { %p411_p5 = scmp.ne.s32.totalorder %s611_s20, %s410_s29  ;;  %p415_p0 = scmp.lt.u32.totalorder %s611_s20, %s659_s3 }
 0x177   : > { %p416_p1 = scmp.lt.u32.totalorder %s414_s9, %s410_s29  ;;  %p418_p6 = scmp.lt.u32.totalorder %s410_s29, %s611_s20 }
 0x178   : > { %p412_p8 = pnand %p411_p5, %p668_p11 }
 0x179   : > { %p417_p3 = por %p416_p1, %p415_p0 }
 0x17a   : > { %p413_p9 = pneg %p412_p8 }
 0x17b   : > { %p419_p12 = por %p418_p6, %p417_p3 }
 0x17d   : > { %p420_p13 = pnand %p419_p12, %p413_p9 }
 0x17f   : > { %423 = shalt.err (!%p420_p13)
}
 0x180   : > { %320 = dma.vmem_to_hbm [thread:$0]  (%p668_p11), %s613_s11, 128, %s611_s20, %s221_s22  }
 0x181 PF: > { %s246_s6 = sand.u32 1, %s450_s12   ;;  %p669_p7 = scmp.ne.s32.totalorder %s664_s25, 0 }
 0x182   : > { %p670_p10 = scmp.ge.s32.totalorder %s462_s15, 2  ;;  %s247_s7 = scalar_lea.sflag [#allocation4], %s246_s6 }
 0x184   : > { %p327_p2 = pnand %p670_p10, %p669_p7 }
 0x186   : > { %445 = dma.done.wait (!%p327_p2), %s247_s7, 128  }
 0x187   : > { %447 = vsyncadd (!%p327_p2), %s247_s7, 4294967168  ;;  %p16_p4 = scmp.ge.s32.totalorder %s511_s18, 4   ;;  %s671_s12 = smov %s454_s13 }
 0x188   : > { %s672_s13 = smov %s458_s14  ;;  %s673_s14 = smov %s523_s21 }
 0x189   : > { %s674_s15 = smov %s511_s18  ;;  %18 = sbr.rel (!%p16_p4) target bundleno = 5 (0x5), region = 77 }
 0x190   :  { %252 = vsyncpa [#allocation3], 1 }
 0x191   :  { %254 = vsyncpa [#allocation3 + $0x1], 1 }
 0x192   :  { %255 = vsyncpa [#allocation4], 1 }
 0x193   :  { %257 = vsyncpa [#allocation4 + $0x1], 1 }

</bundles_post_ra>
